<compile_context>
chip_gen: v7x
topology: tpu7x:2x2x1
jax: 0.10.0
libtpu: 0.0.40
codegen_flags: <defaults>
</compile_context>

<pallas_src>
import functools
import math

import jax
import jax.numpy as jnp
from jax import lax
from jax.experimental import pallas as pl
from jax.experimental.pallas import tpu as pltpu

_MASK_VALUE = -1e30   # large finite negative instead of -inf (avoids NaN rows)
_LN_EPS = 1e-5        # torch.nn.LayerNorm default eps


def _pick_tile(n, prefs):
    """Largest preferred tile dividing n, else the whole dimension."""
    # TODO(synk): lengths that are not multiples of 128 fall back to a whole-dim
    # block; pad L outside for graceful tiling of very long unaligned sequences.
    for p in prefs:
        if n >= p and n % p == 0:
            return p
    return n


def _nbytes(shape, dtype):
    return math.prod(shape) * jnp.dtype(dtype).itemsize


def _compiler_params(dims, block_nbytes):
    """dimension_semantics + a VMEM limit derived from the resident blocks
    (x2 for double buffering) with headroom."""
    est = 2 * int(sum(block_nbytes)) + (8 << 20)
    return pltpu.CompilerParams(
        dimension_semantics=dims,
        vmem_limit_bytes=int(min(max(est, 32 << 20), 112 << 20)))


# ----------------------------------------------------------------------------
# Kernel 1: fused Q/K/V projection (one wide matmul, lane-dense outputs)
# ----------------------------------------------------------------------------
def _qkv_proj_kernel(x_ref, w_ref, b_ref, q_ref, k_ref, v_ref, *,
                     dq, dk, compute_dtype):
    x = x_ref[...].astype(compute_dtype)
    y = jnp.dot(x, w_ref[...], preferred_element_type=jnp.float32) + b_ref[...]
    q_ref[...] = y[:, :dq].astype(q_ref.dtype)
    k_ref[...] = y[:, dq:dq + dk].astype(k_ref.dtype)
    v_ref[...] = y[:, dq + dk:].astype(v_ref.dtype)


def _qkv_projection(x, w_qkv, b_qkv, dq, dk, dv, compute_dtype):
    B, L, d_model = x.shape
    wtot = dq + dk + dv
    TL = _pick_tile(L, (512, 256, 128))
    grid = (B, L // TL)
    row = lambda b, t: (b, t, 0)
    full = lambda b, t: (0, 0)

    est = [_nbytes((TL, d_model), x.dtype), _nbytes((d_model, wtot), w_qkv.dtype),
           _nbytes((1, wtot), jnp.float32), _nbytes((TL, wtot), jnp.float32),
           _nbytes((TL, dq), compute_dtype), _nbytes((TL, dk), compute_dtype),
           _nbytes((TL, dv), compute_dtype)]

    return pl.pallas_call(
        functools.partial(_qkv_proj_kernel, dq=dq, dk=dk,
                          compute_dtype=compute_dtype),
        out_shape=(jax.ShapeDtypeStruct((B, L, dq), compute_dtype),
                   jax.ShapeDtypeStruct((B, L, dk), compute_dtype),
                   jax.ShapeDtypeStruct((B, L, dv), compute_dtype)),
        grid=grid,
        in_specs=[
            pl.BlockSpec((None, TL, d_model), row),
            pl.BlockSpec((d_model, wtot), full),
            pl.BlockSpec((1, wtot), full),
        ],
        out_specs=(
            pl.BlockSpec((None, TL, dq), row),
            pl.BlockSpec((None, TL, dk), row),
            pl.BlockSpec((None, TL, dv), row),
        ),
        compiler_params=_compiler_params(("parallel", "parallel"), est),
    )(x, w_qkv, b_qkv)


# ----------------------------------------------------------------------------
# Kernel 2: multi-head attention, flash-style over a key grid axis.
# q/k/v arrive merged-head (B, L, H*d); the context leaves merged-head too.
# ----------------------------------------------------------------------------
def _attention_kernel(*refs, n_head, d_k, d_v, has_mask, return_attn,
                      approx_reciprocal, compute_dtype):
    if has_mask:
        q_ref, k_ref, v_ref, mask_ref = refs[:4]
        rest = refs[4:]
    else:
        q_ref, k_ref, v_ref = refs[:3]
        mask_ref = None
        rest = refs[3:]
    out_ref = rest[0]
    if return_attn:
        attn_ref = rest[1]
        m_sc, l_sc, acc_sc = rest[2], rest[3], rest[4]
    else:
        attn_ref = None
        m_sc, l_sc, acc_sc = rest[1], rest[2], rest[3]

    ki = pl.program_id(2)
    nk = pl.num_programs(2)

    @pl.when(ki == 0)
    def _():
        m_sc[...] = jnp.full(m_sc.shape, -jnp.inf, m_sc.dtype)
        l_sc[...] = jnp.zeros(l_sc.shape, l_sc.dtype)
        acc_sc[...] = jnp.zeros(acc_sc.shape, acc_sc.dtype)

    q = q_ref[...].astype(compute_dtype)   # (TQ, H*d_k), 1/temp already folded
    k = k_ref[...].astype(compute_dtype)   # (TK, H*d_k)
    v = v_ref[...].astype(compute_dtype)   # (TK, H*d_v)
    masked = (mask_ref[...] != 0) if has_mask else None   # (TQ, TK) bool

    for h in range(n_head):
        q_h = q[:, h * d_k:(h + 1) * d_k]
        k_h = k[:, h * d_k:(h + 1) * d_k]
        v_h = v[:, h * d_v:(h + 1) * d_v]

        # (TQ, d_k) x (TK, d_k) -> (TQ, TK), contracting the last dim of both.
        s = lax.dot_general(q_h, k_h, (((1,), (1,)), ((), ())),
                            preferred_element_type=jnp.float32)
        if has_mask:
            s = jnp.where(masked, _MASK_VALUE, s)

        m_prev = m_sc[h, :, :]
        l_prev = l_sc[h, :, :]
        m_new = jnp.maximum(m_prev, jnp.max(s, axis=-1, keepdims=True))
        p = jnp.exp(s - m_new)
        alpha = jnp.exp(m_prev - m_new)
        l_new = alpha * l_prev + jnp.sum(p, axis=-1, keepdims=True)
        acc_new = alpha * acc_sc[h, :, :] + jnp.dot(
            p.astype(compute_dtype), v_h, preferred_element_type=jnp.float32)
        m_sc[h, :, :] = m_new
        l_sc[h, :, :] = l_new
        acc_sc[h, :, :] = acc_new

        if return_attn:
            # Only valid because the wrapper forces a single key block (nk==1).
            inv_l = pl.reciprocal(l_new, approx=approx_reciprocal)
            attn_ref[h, :, :] = (p * inv_l).astype(attn_ref.dtype)

    # TODO(synk): attention dropout (nn.Dropout(0.1)) is eval-mode identity.
    @pl.when(ki == nk - 1)
    def _():
        parts = []
        for h in range(n_head):
            inv_l = pl.reciprocal(l_sc[h, :, :], approx=approx_reciprocal)
            parts.append(acc_sc[h, :, :] * inv_l)
        out_ref[...] = jnp.concatenate(parts, axis=-1).astype(out_ref.dtype)


def _multi_head_attention(q, k, v, attn_mask, *, n_head, d_k, d_v,
                          return_attn, approx_reciprocal, compute_dtype):
    # q: (B, Lq, H*d_k), k: (B, Lk, H*d_k), v: (B, Lk, H*d_v); q pre-scaled.
    B, Lq, hdk = q.shape
    Lk = k.shape[1]
    hdv = v.shape[2]
    has_mask = attn_mask is not None

    TQ = _pick_tile(Lq, (256, 128))
    # Normalized attention weights require a single key block.
    TK = Lk if return_attn else _pick_tile(Lk, (512, 256, 128))
    grid = (B, Lq // TQ, Lk // TK)

    in_specs = [
        pl.BlockSpec((None, TQ, hdk), lambda b, qi, ki: (b, qi, 0)),
        pl.BlockSpec((None, TK, hdk), lambda b, qi, ki: (b, ki, 0)),
        pl.BlockSpec((None, TK, hdv), lambda b, qi, ki: (b, ki, 0)),
    ]
    inputs = [q, k, v]
    if has_mask:
        in_specs.append(pl.BlockSpec((None, TQ, TK), lambda b, qi, ki: (b, qi, ki)))
        inputs.append(attn_mask.astype(jnp.int8))   # 4x less HBM than int32

    out_shape = [jax.ShapeDtypeStruct((B, Lq, hdv), q.dtype)]
    out_specs = [pl.BlockSpec((None, TQ, hdv), lambda b, qi, ki: (b, qi, 0))]
    if return_attn:
        out_shape.append(jax.ShapeDtypeStruct((B, n_head, Lq, Lk), jnp.float32))
        out_specs.append(pl.BlockSpec((None, n_head, TQ, Lk),
                                      lambda b, qi, ki: (b, 0, qi, 0)))

    est = [_nbytes((TQ, hdk), q.dtype), _nbytes((TK, hdk), k.dtype),
           _nbytes((TK, hdv), v.dtype), _nbytes((TQ, hdv), q.dtype),
           2 * _nbytes((n_head, TQ, 1), jnp.float32),
           _nbytes((n_head, TQ, d_v), jnp.float32),
           4 * _nbytes((TQ, TK), jnp.float32)]
    if has_mask:
        est.append(_nbytes((TQ, TK), jnp.int8))
    if return_attn:
        est.append(_nbytes((n_head, TQ, Lk), jnp.float32))

    kernel = functools.partial(
        _attention_kernel, n_head=n_head, d_k=d_k, d_v=d_v,
        has_mask=has_mask, return_attn=return_attn,
        approx_reciprocal=approx_reciprocal, compute_dtype=compute_dtype)

    outs = pl.pallas_call(
        kernel,
        out_shape=tuple(out_shape),
        grid=grid,
        in_specs=in_specs,
        out_specs=tuple(out_specs),
        scratch_shapes=[pltpu.VMEM((n_head, TQ, 1), jnp.float32),
                        pltpu.VMEM((n_head, TQ, 1), jnp.float32),
                        pltpu.VMEM((n_head, TQ, d_v), jnp.float32)],
        compiler_params=_compiler_params(
            ("parallel", "parallel", "arbitrary"), est),
    )(*inputs)

    if return_attn:
        return outs[0], outs[1]
    ctx = outs[0] if isinstance(outs, (tuple, list)) else outs
    return ctx, None


# ----------------------------------------------------------------------------
# Kernel 3: fc + residual + LN1 + mask  fused with  FFN + residual + LN2 + mask
# (FFN tiled over d_inner with an f32 accumulator on the third grid axis).
# ----------------------------------------------------------------------------
def _post_attn_kernel(ctx_ref, wfc_ref, bfc_ref, res_ref, g1_ref, be1_ref,
                      npm_ref, w1_ref, b1_ref, w2_ref, b2_ref, g2_ref, be2_ref,
                      out_ref, y_sc, acc_sc, *, eps, compute_dtype):
    kf = pl.program_id(2)
    nf = pl.num_programs(2)

    @pl.when(kf == 0)
    def _():
        # fc projection + residual + LayerNorm1 + non_pad_mask
        y = jnp.dot(ctx_ref[...].astype(compute_dtype), wfc_ref[...],
                    preferred_element_type=jnp.float32) + bfc_ref[...]
        # TODO(synk): fc-output dropout (nn.Dropout) is eval-mode identity here.
        y = y + res_ref[...].astype(jnp.float32)
        mean = jnp.mean(y, axis=-1, keepdims=True)
        cen = y - mean
        var = jnp.mean(cen * cen, axis=-1, keepdims=True)
        y = cen * lax.rsqrt(var + eps)
        y = y * g1_ref[...] + be1_ref[...]
        y = y * npm_ref[...].astype(jnp.float32)
        y_sc[...] = y
        acc_sc[...] = jnp.zeros(acc_sc.shape, acc_sc.dtype)

    # FFN chunk over d_inner: w2_chunk(relu(w1_chunk @ y + b1_chunk))
    h = jnp.dot(y_sc[...].astype(compute_dtype), w1_ref[...],
                preferred_element_type=jnp.float32) + b1_ref[...]
    h = jnp.maximum(h, 0.0)
    acc_sc[...] += jnp.dot(h.astype(compute_dtype), w2_ref[...],
                           preferred_element_type=jnp.float32)

    @pl.when(kf == nf - 1)
    def _():
        # TODO(synk): FFN dropout (nn.Dropout) is eval-mode identity here.
        z = acc_sc[...] + b2_ref[...] + y_sc[...]
        mean = jnp.mean(z, axis=-1, keepdims=True)
        cen = z - mean
        var = jnp.mean(cen * cen, axis=-1, keepdims=True)
        z = cen * lax.rsqrt(var + eps)
        z = z * g2_ref[...] + be2_ref[...]
        z = z * npm_ref[...].astype(jnp.float32)
        out_ref[...] = z.astype(out_ref.dtype)


def _post_attention(ctx, enc_input, npm, w_fc, b_fc, g1, be1,
                    w1, b1, w2, b2, g2, be2, *, compute_dtype):
    B, L, d_model = enc_input.shape
    d_ctx = ctx.shape[-1]
    d_inner = w1.shape[1]
    TL = _pick_tile(L, (512, 256, 128))
    TI = _pick_tile(d_inner, (2048, 1024, 512, 256, 128))
    grid = (B, L // TL, d_inner // TI)

    row = lambda b, t, f: (b, t, 0)
    full = lambda b, t, f: (0, 0)

    est = [_nbytes((TL, d_ctx), ctx.dtype),
           _nbytes((d_ctx, d_model), w_fc.dtype),
           _nbytes((TL, d_model), enc_input.dtype),
           _nbytes((d_model, TI), w1.dtype),
           _nbytes((TI, d_model), w2.dtype),
           _nbytes((TL, d_model), enc_input.dtype),        # out
           2 * _nbytes((TL, d_model), jnp.float32),        # scratch
           _nbytes((TL, TI), jnp.float32)]                 # relu intermediate

    return pl.pallas_call(
        functools.partial(_post_attn_kernel, eps=_LN_EPS,
                          compute_dtype=compute_dtype),
        out_shape=jax.ShapeDtypeStruct((B, L, d_model), enc_input.dtype),
        grid=grid,
        in_specs=[
            pl.BlockSpec((None, TL, d_ctx), row),
            pl.BlockSpec((d_ctx, d_model), full),
            pl.BlockSpec((1, d_model), full),
            pl.BlockSpec((None, TL, d_model), row),
            pl.BlockSpec((1, d_model), full),
            pl.BlockSpec((1, d_model), full),
            pl.BlockSpec((None, TL, 1), row),
            pl.BlockSpec((d_model, TI), lambda b, t, f: (0, f)),
            pl.BlockSpec((1, TI), lambda b, t, f: (0, f)),
            pl.BlockSpec((TI, d_model), lambda b, t, f: (f, 0)),
            pl.BlockSpec((1, d_model), full),
            pl.BlockSpec((1, d_model), full),
            pl.BlockSpec((1, d_model), full),
        ],
        out_specs=pl.BlockSpec((None, TL, d_model), row),
        scratch_shapes=[pltpu.VMEM((TL, d_model), jnp.float32),
                        pltpu.VMEM((TL, d_model), jnp.float32)],
        compiler_params=_compiler_params(
            ("parallel", "parallel", "arbitrary"), est),
    )(ctx, w_fc, b_fc, enc_input, g1, be1, npm, w1, b1, w2, b2, g2, be2)


# ----------------------------------------------------------------------------
# EncoderLayer forward (chains the three Pallas kernels)
# ----------------------------------------------------------------------------
def encoder_layer_forward(params, enc_input, non_pad_mask=None,
                          slf_attn_mask=None, *, return_attn=False,
                          approx_reciprocal=True, compute_dtype=jnp.bfloat16):
    B, L, d_model = enc_input.shape
    H, d_k, d_v = params["n_head"], params["d_k"], params["d_v"]
    cd = enc_input.dtype if compute_dtype is None else compute_dtype

    # ---- MultiHeadAttention sublayer ----
    inv_temp = 1.0 / math.sqrt(d_k)
    # Fold 1/temperature exactly into the q projection; concat for a single
    # wide MXU matmul; weights stored/streamed in the compute dtype (bf16).
    w_qkv = jnp.concatenate(
        [params["w_qs"] * inv_temp, params["w_ks"], params["w_vs"]],
        axis=1).astype(cd)
    b_qkv = jnp.concatenate(
        [params["b_qs"] * inv_temp, params["b_ks"], params["b_vs"]]
    ).astype(jnp.float32).reshape(1, -1)

    q, k, v = _qkv_projection(enc_input, w_qkv, b_qkv,
                              H * d_k, H * d_k, H * d_v, cd)

    ctx, attn = _multi_head_attention(
        q, k, v, slf_attn_mask,
        n_head=H, d_k=d_k, d_v=d_v,
        return_attn=return_attn,
        approx_reciprocal=approx_reciprocal,
        compute_dtype=cd)

    if non_pad_mask is None:
        npm = jnp.ones((B, L, 1), jnp.float32)
    else:
        npm = non_pad_mask.astype(jnp.float32)

    enc_output = _post_attention(
        ctx, enc_input, npm,
        params["w_fc"].astype(cd), params["b_fc"].reshape(1, -1),
        params["ln1_g"].reshape(1, -1), params["ln1_b"].reshape(1, -1),
        params["w_1"].astype(cd), params["b_1"].reshape(1, -1),
        params["w_2"].astype(cd), params["b_2"].reshape(1, -1),
        params["ln2_g"].reshape(1, -1), params["ln2_b"].reshape(1, -1),
        compute_dtype=cd)

    if attn is not None:
        # Match the PyTorch module: (n_head * B, L, L), head-major.
        attn = attn.transpose(1, 0, 2, 3).reshape(H * B, L, L)
    return enc_output, attn


# ----------------------------------------------------------------------------
# Parameters (weights stored as (in, out) == torch weight.T) and pure-JAX ref
# ----------------------------------------------------------------------------
def init_encoder_layer_params(key, d_model, d_inner, n_head, d_k, d_v,
                              dtype=jnp.float32):
    ks = jax.random.split(key, 16)

    def nrm(k, shape, scale):
        return (scale * jax.random.normal(k, shape)).astype(dtype)

    return {
        "n_head": n_head, "d_k": d_k, "d_v": d_v,
        "w_qs": nrm(ks[0], (d_model, n_head * d_k), math.sqrt(2.0 / (d_model + d_k))),
        "b_qs": nrm(ks[1], (n_head * d_k,), 0.1),
        "w_ks": nrm(ks[2], (d_model, n_head * d_k), math.sqrt(2.0 / (d_model + d_k))),
        "b_ks": nrm(ks[3], (n_head * d_k,), 0.1),
        "w_vs": nrm(ks[4], (d_model, n_head * d_v), math.sqrt(2.0 / (d_model + d_v))),
        "b_vs": nrm(ks[5], (n_head * d_v,), 0.1),
        "w_fc": nrm(ks[6], (n_head * d_v, d_model), math.sqrt(2.0 / (n_head * d_v + d_model))),
        "b_fc": nrm(ks[7], (d_model,), 0.1),
        "ln1_g": 1.0 + nrm(ks[8], (d_model,), 0.1),
        "ln1_b": nrm(ks[9], (d_model,), 0.1),
        "w_1": nrm(ks[10], (d_model, d_inner), math.sqrt(2.0 / (d_model + d_inner))),
        "b_1": nrm(ks[11], (d_inner,), 0.1),
        "w_2": nrm(ks[12], (d_inner, d_model), math.sqrt(2.0 / (d_model + d_inner))),
        "b_2": nrm(ks[13], (d_model,), 0.1),
        "ln2_g": 1.0 + nrm(ks[14], (d_model,), 0.1),
        "ln2_b": nrm(ks[15], (d_model,), 0.1),
    }


def _layer_norm_ref(x, g, b, eps=_LN_EPS):
    mean = jnp.mean(x, axis=-1, keepdims=True)
    var = jnp.mean((x - mean) ** 2, axis=-1, keepdims=True)
    return (x - mean) * jax.lax.rsqrt(var + eps) * g + b


def _reference_encoder_layer(params, x, non_pad_mask, slf_attn_mask):
    B, L, d_model = x.shape
    H, d_k, d_v = params["n_head"], params["d_k"], params["d_v"]
    q = x @ params["w_qs"] + params["b_qs"]
    k = x @ params["w_ks"] + params["b_ks"]
    v = x @ params["w_vs"] + params["b_vs"]
    qh = q.reshape(B, L, H, d_k).transpose(0, 2, 1, 3)
    kh = k.reshape(B, L, H, d_k).transpose(0, 2, 1, 3)
    vh = v.reshape(B, L, H, d_v).transpose(0, 2, 1, 3)
    scores = jnp.einsum("bhqd,bhkd->bhqk", qh, kh) / math.sqrt(d_k)
    if slf_attn_mask is not None:
        scores = jnp.where(slf_attn_mask[:, None, :, :] != 0, _MASK_VALUE, scores)
    attn = jax.nn.softmax(scores, axis=-1)
    ctx = jnp.einsum("bhqk,bhkd->bhqd", attn, vh)
    ctx = ctx.transpose(0, 2, 1, 3).reshape(B, L, H * d_v)
    y = ctx @ params["w_fc"] + params["b_fc"]
    y = _layer_norm_ref(y + x, params["ln1_g"], params["ln1_b"])
    npm = (jnp.ones((B, L, 1), x.dtype) if non_pad_mask is None
           else non_pad_mask.astype(x.dtype))
    y = y * npm
    h = jax.nn.relu(y @ params["w_1"] + params["b_1"])
    z = h @ params["w_2"] + params["b_2"]
    z = _layer_norm_ref(z + y, params["ln2_g"], params["ln2_b"])
    z = z * npm
    attn_hb = attn.transpose(1, 0, 2, 3).reshape(H * B, L, L)
    return z, attn_hb


if __name__ == "__main__":
    B, L = 2, 8
    d_model, d_inner = 32, 64
    n_head, d_k, d_v = 4, 8, 8

    root = jax.random.PRNGKey(0)
    k_par, k_x = jax.random.split(root)
    params = init_encoder_layer_params(k_par, d_model, d_inner, n_head, d_k, d_v)
    enc_input = jax.random.normal(k_x, (B, L, d_model), dtype=jnp.float32)

    # Deterministic padding: batch 0 is full length, batch 1 has 2 pad tokens.
    lengths = jnp.array([L, L - 2])
    pad = jnp.arange(L)[None, :] >= lengths[:, None]                 # (B, L)
    slf_attn_mask = jnp.broadcast_to(pad[:, None, :], (B, L, L))     # mask pad keys
    non_pad_mask = (~pad)[:, :, None].astype(jnp.float32)            # (B, L, 1)

    ref_out, ref_attn = _reference_encoder_layer(params, enc_input,
                                                 non_pad_mask, slf_attn_mask)

    # 1) f32 + exact reciprocal + attention weights: tight check vs pure JAX.
    out, attn = encoder_layer_forward(params, enc_input, non_pad_mask,
                                      slf_attn_mask, return_attn=True,
                                      approx_reciprocal=False,
                                      compute_dtype=jnp.float32)
    out = jax.block_until_ready(out)
    attn = jax.block_until_ready(attn)
    assert jnp.allclose(out, ref_out, atol=1e-3, rtol=1e-3), \
        float(jnp.max(jnp.abs(out - ref_out)))
    assert jnp.allclose(attn, ref_attn, atol=1e-3, rtol=1e-3), \
        float(jnp.max(jnp.abs(attn - ref_attn)))

    # 2) Default fast path (bf16 MXU, approx EUP reciprocal, no attn writeback).
    out2, attn2 = encoder_layer_forward(params, enc_input, non_pad_mask,
                                        slf_attn_mask)
    out2 = jax.block_until_ready(out2)
    assert attn2 is None
    assert jnp.allclose(out2, ref_out, atol=1e-1, rtol=1e-1), \
        float(jnp.max(jnp.abs(out2 - ref_out)))

    # 3) mask=None specialization (no mask DMA), f32 exact path.
    out3, attn3 = encoder_layer_forward(params, enc_input, non_pad_mask, None,
                                        approx_reciprocal=False,
                                        compute_dtype=jnp.float32)
    out3 = jax.block_until_ready(out3)
    ref_out3, _ = _reference_encoder_layer(params, enc_input, non_pad_mask, None)
    assert attn3 is None
    assert jnp.allclose(out3, ref_out3, atol=1e-3, rtol=1e-3), \
        float(jnp.max(jnp.abs(out3 - ref_out3)))

    print("KERNEL_OK")
</pallas_src>

<mosaic_0001>
module attributes {stable_mosaic.version = 11 : i64} {
  func.func @_qkv_proj_kernel(%arg0: i32, %arg1: i32, %arg2: memref<1x8x32xf32, #tpu.memory_space<vmem>>, %arg3: memref<32x96xf32, #tpu.memory_space<vmem>>, %arg4: memref<1x96xf32, #tpu.memory_space<vmem>>, %arg5: memref<1x8x32xf32, #tpu.memory_space<vmem>>, %arg6: memref<1x8x32xf32, #tpu.memory_space<vmem>>, %arg7: memref<1x8x32xf32, #tpu.memory_space<vmem>>) attributes {dimension_semantics = [#tpu.dimension_semantics<parallel>, #tpu.dimension_semantics<parallel>], iteration_bounds = array<i64: 2, 1>, scalar_prefetch = 0 : i64, scratch_operands = 0 : i64, tpu.core_type = #tpu.core_type<tc>, window_params = [{transform_indices = @transform_0, window_bounds = array<i64: 1, 8, 32>}, {pipeline_mode = #tpu.pipeline_mode<synchronous>, transform_indices = @transform_1, window_bounds = array<i64: 32, 96>}, {pipeline_mode = #tpu.pipeline_mode<synchronous>, transform_indices = @transform_2, window_bounds = array<i64: 1, 96>}, {transform_indices = @transform_3, window_bounds = array<i64: 1, 8, 32>}, {transform_indices = @transform_4, window_bounds = array<i64: 1, 8, 32>}, {transform_indices = @transform_5, window_bounds = array<i64: 1, 8, 32>}]} {
    %c0 = arith.constant 0 : index
    %c0_0 = arith.constant 0 : index
    %c0_1 = arith.constant 0 : index
    %0 = vector.load %arg2[%c0, %c0_0, %c0_1] : memref<1x8x32xf32, #tpu.memory_space<vmem>>, vector<1x8x32xf32>
    %1 = vector.shape_cast %0 : vector<1x8x32xf32> to vector<8x32xf32>
    %c0_2 = arith.constant 0 : index
    %c0_3 = arith.constant 0 : index
    %2 = vector.load %arg3[%c0_2, %c0_3] : memref<32x96xf32, #tpu.memory_space<vmem>>, vector<32x96xf32>
    %cst = arith.constant dense<0.000000e+00> : vector<8x96xf32>
    %3 = tpu.matmul %1, %2, %cst {dimension_numbers = #tpu.dot_dimension_numbers<[1], [0], [0], [1], [0, 0, 1, 1], [], []>} : vector<8x32xf32>, vector<32x96xf32>, vector<8x96xf32> -> vector<8x96xf32>
    %c0_4 = arith.constant 0 : index
    %c0_5 = arith.constant 0 : index
    %4 = vector.load %arg4[%c0_4, %c0_5] : memref<1x96xf32, #tpu.memory_space<vmem>>, vector<1x96xf32>
    %5 = vector.broadcast %4 : vector<1x96xf32> to vector<8x96xf32>
    %6 = arith.addf %3, %5 : vector<8x96xf32>
    %7 = vector.extract_strided_slice %6 {offsets = [0, 0], sizes = [8, 32], strides = [1, 1]} : vector<8x96xf32> to vector<8x32xf32>
    %c0_6 = arith.constant 0 : index
    %c0_7 = arith.constant 0 : index
    %c0_8 = arith.constant 0 : index
    %8 = vector.load %arg5[%c0_6, %c0_7, %c0_8] : memref<1x8x32xf32, #tpu.memory_space<vmem>>, vector<1x8x32xf32>
    %9 = vector.shape_cast %8 : vector<1x8x32xf32> to vector<8x32xf32>
    %10 = vector.shape_cast %7 : vector<8x32xf32> to vector<1x8x32xf32>
    tpu.vector_store %arg5[%c0_6, %c0_7, %c0_8], %10 {strides = array<i32>} : memref<1x8x32xf32, #tpu.memory_space<vmem>>, vector<1x8x32xf32>,
    %11 = vector.extract_strided_slice %6 {offsets = [0, 32], sizes = [8, 32], strides = [1, 1]} : vector<8x96xf32> to vector<8x32xf32>
    %c0_9 = arith.constant 0 : index
    %c0_10 = arith.constant 0 : index
    %c0_11 = arith.constant 0 : index
    %12 = vector.load %arg6[%c0_9, %c0_10, %c0_11] : memref<1x8x32xf32, #tpu.memory_space<vmem>>, vector<1x8x32xf32>
    %13 = vector.shape_cast %12 : vector<1x8x32xf32> to vector<8x32xf32>
    %14 = vector.shape_cast %11 : vector<8x32xf32> to vector<1x8x32xf32>
    tpu.vector_store %arg6[%c0_9, %c0_10, %c0_11], %14 {strides = array<i32>} : memref<1x8x32xf32, #tpu.memory_space<vmem>>, vector<1x8x32xf32>,
    %15 = vector.extract_strided_slice %6 {offsets = [0, 64], sizes = [8, 32], strides = [1, 1]} : vector<8x96xf32> to vector<8x32xf32>
    %c0_12 = arith.constant 0 : index
    %c0_13 = arith.constant 0 : index
    %c0_14 = arith.constant 0 : index
    %16 = vector.load %arg7[%c0_12, %c0_13, %c0_14] : memref<1x8x32xf32, #tpu.memory_space<vmem>>, vector<1x8x32xf32>
    %17 = vector.shape_cast %16 : vector<1x8x32xf32> to vector<8x32xf32>
    %18 = vector.shape_cast %15 : vector<8x32xf32> to vector<1x8x32xf32>
    tpu.vector_store %arg7[%c0_12, %c0_13, %c0_14], %18 {strides = array<i32>} : memref<1x8x32xf32, #tpu.memory_space<vmem>>, vector<1x8x32xf32>,
    return
  }
  func.func @transform_0(%arg0: i32, %arg1: i32) -> (i32, i32, i32) {
    %c0_i32 = arith.constant 0 : i32
    %c0_i32_0 = arith.constant 0 : i32
    return %arg0, %arg1, %c0_i32 : i32, i32, i32
  }
  func.func @transform_1(%arg0: i32, %arg1: i32) -> (i32, i32) {
    %c0_i32 = arith.constant 0 : i32
    %c0_i32_0 = arith.constant 0 : i32
    %c0_i32_1 = arith.constant 0 : i32
    return %c0_i32, %c0_i32_0 : i32, i32
  }
  func.func @transform_2(%arg0: i32, %arg1: i32) -> (i32, i32) {
    %c0_i32 = arith.constant 0 : i32
    %c0_i32_0 = arith.constant 0 : i32
    %c0_i32_1 = arith.constant 0 : i32
    return %c0_i32, %c0_i32_0 : i32, i32
  }
  func.func @transform_3(%arg0: i32, %arg1: i32) -> (i32, i32, i32) {
    %c0_i32 = arith.constant 0 : i32
    %c0_i32_0 = arith.constant 0 : i32
    return %arg0, %arg1, %c0_i32 : i32, i32, i32
  }
  func.func @transform_4(%arg0: i32, %arg1: i32) -> (i32, i32, i32) {
    %c0_i32 = arith.constant 0 : i32
    %c0_i32_0 = arith.constant 0 : i32
    return %arg0, %arg1, %c0_i32 : i32, i32, i32
  }
  func.func @transform_5(%arg0: i32, %arg1: i32) -> (i32, i32, i32) {
    %c0_i32 = arith.constant 0 : i32
    %c0_i32_0 = arith.constant 0 : i32
    return %arg0, %arg1, %c0_i32 : i32, i32, i32
  }
}

</mosaic_0001>

<bundles_post_ra>
// kernel: tpu_custom_call.1
= control target key start
LH: loop header
LB: loop body
LE: loop exit
PB: predicated region body
PF: predicated region fallthrough
CT: control target
= control target key end

     0   :  { %11 = vsyncpa [#allocation3], 0  ;;  %s1279_s0 = inlined_call_operand.hbm [shape: f32[2,8,32], index: 0, kind: input, shape index: {}]   ;;  %s1280_s1 = inlined_call_operand.hbm [shape: f32[32,96], index: 1, kind: input, shape index: {}]   ;;  %s1281_s2 = inlined_call_operand.vmem [shape: f32[1,96], index: 2, kind: input, shape index: {}]   ;;  %s1282_s3 = inlined_call_operand.hbm [shape: f32[2,8,32], index: 3, kind: output, shape index: {0}]   ;;  %s1283_s4 = inlined_call_operand.hbm [shape: f32[2,8,32], index: 4, kind: output, shape index: {1}]   ;;  %s1284_s5 = inlined_call_operand.hbm [shape: f32[2,8,32], index: 5, kind: output, shape index: {2}]  }
   0x1   :  { %13 = vsyncpa [#allocation3 + $0x1], 0 }
   0x2   :  { %14 = vsyncpa [#allocation6], 0 }
   0x3   :  { %15 = vsyncpa [#allocation4], 0 }
   0x4   :  { %17 = vsyncpa [#allocation4 + $0x1], 0 }
   0x5   :  { %18 = vsyncpa [#allocation9], 0 }
   0x6   :  { %20 = vsyncpa [#allocation9 + $0x1], 0  ;;  %s979_s18 = smov 0   ;;  %s981_s19 = smov 0  }
   0x7   :  { %s983_s20 = smov 0   ;;  %s985_s21 = smov 0  }
   0x8   :  { %s987_s22 = smov 0   ;;  %s989_s23 = smov 0  }
   0x9 LB: > { %s1010_s24 = sadd.s32 4294967295, %s935_s23   ;;  %s1288_s25 = sadd.s32 4294967294, %s935_s23   ;;  %s935_s23 = sphi %s989_s23, %s26_s23   ;;  %s931_s22 = sphi %s987_s22, %s1308_s22   ;;  %s927_s21 = sphi %s985_s21, %s1307_s21   ;;  %s923_s20 = sphi %s983_s20, %s1306_s20   ;;  %s919_s19 = sphi %s981_s19, %s1305_s19   ;;  %s915_s18 = sphi %s979_s18, %s1304_s18  }
   0xa   : > { %p60_p0 = scmp.ne.s32.totalorder %s919_s19, %s915_s18  ;;  %p1285_p1 = scmp.eq.s32.totalorder %s1010_s24, 0 }
   0xb   : > { %p134_p3 = scmp.eq.s32.totalorder %s1288_s25, 1  ;;  %p598_p5 = scmp.ge.s32.totalorder %s935_s23, 1 }
   0xc   : > { %p1021_p4 = por %p1285_p1, %p60_p0  ;;  %p197_p7 = scmp.lt.s32.totalorder %s935_s23, 3 }
   0xd   : > { %p1026_p6 = por %p134_p3, %p60_p0  ;;  %s937_s29 = smov [#allocation5]  }
   0xe   : > { %s1289_s26 = scalar_select %p1021_p4, 1, 0 }
   0xf   : > { %s1290_s27 = scalar_select %p1026_p6, 1, 0 }
  0x10   : > { %p1031_p8 = pnand %p598_p5, %p197_p7  ;;  %s209_s30 = sshll.u32 %s937_s29, 4  ;;  %s210_s30 = int_to_ptr.vmem [resolvable:$true] %s209_s30 }
  0x11   : > { %s38_s7 = sadd.s32 1, %s931_s22  ;;  %s731_s10 = scalar_lea.hbm %s1280_s1, 512 }
  0x12   : > { %s1291_s28 = scalar_select %p1031_p8, 1, 0 }
  0x13   : > { %p653_p9 = pneg %p1031_p8  ;;  %p732_p12 = scmp.ne.s32.totalorder %s1280_s1, %s731_s10 }
  0x14   : > { %p738_p5 = scmp.lt.u32.totalorder %s731_s10, %s1280_s1 }
  0x15   : > { %p1040_p11 = pnand %p653_p9, %p1285_p1 }
  0x17   : > { %p733_p13 = pneg %p1040_p11 }
  0x19   : > { %p734_p0 = pnand %p733_p13, %p732_p12 }
  0x1b   : > { %p735_p3 = pneg %p734_p0 }
  0x1d   : > { %p740_p7 = pnand %p738_p5, %p735_p3 }
  0x1f   : > { %743 = shalt.err (!%p740_p7)
}
  0x20   : > { %s744_s15 = scalar_lea.vmem %s210_s30, 512  ;;  %p752_p2 = scmp.lt.s32.totalorder %s210_s30, %s210_s30 }
  0x21   : > { %p745_p9 = scmp.ne.s32.totalorder %s210_s30, %s744_s15  ;;  %p753_p6 = scmp.lt.s32.totalorder %s744_s15, %s744_s15 }
  0x23   : > { %p747_p10 = pnand %p745_p9, %p733_p13  ;;  %p754_p4 = por %p753_p6, %p752_p2 }
  0x25   : > { %p748_p1 = pneg %p747_p10 }
  0x27   : > { %p755_p8 = pnand %p754_p4, %p748_p1 }
  0x29   : > { %758 = shalt.err (!%p755_p8)
}
  0x2a   : > { %s938_s16 = smov 128   ;;  %s939_s17 = smov 8  }
  0x2b   : > { %656 = dma.hbm_to_vmem [thread:$0]  (!%p1040_p11), %s1280_s1, 512, %s210_s30, [#allocation6], %s938_s16, %s938_s16, %s939_s17  }
  0x2c   : > { %p40_p1 = scmp.ge.s32.totalorder %s38_s7, 2  ;;  %s47_s9 = sadd.s32 1, %s923_s20 }
  0x2d   : > { %p54_p2 = scmp.ne.s32.totalorder %s923_s20, %s919_s19  ;;  %p55_p4 = scmp.eq.s32.totalorder %s935_s23, 0 }
  0x2e   : > { %s1310_s7 = smov (%p40_p1, %s38_s7), 0  ;;  %p1294_p8 = scmp.eq.s32.totalorder %s1010_s24, 1 }
  0x2f   : > { %p1067_p6 = por %p55_p4, %p54_p2  ;;  %s42_s6 = ssub.s32 %s931_s22, %s1310_s7 }
  0x30   : > { %p1073_p10 = por %p1294_p8, %p54_p2  ;;  %p672_p12 = scmp.lt.s32.totalorder %s935_s23, 2 }
  0x31   : > { %p45_p11 = scmp.eq.s32.totalorder %s42_s6, 0  ;;  %s226_s30 = sand.u32 1, %s923_s20  }
  0x32   : > { %s601_s12 = sshll.u32 %s226_s30, 3  ;;  %s602_s14 = sshll.u32 %s931_s22, 7 }
  0x33   : > { %s1082_s13 = scalar_select %p45_p11, %s923_s20, %s47_s9  }
  0x34   : > { %s1088_s17 = scalar_lea.hbm %s1279_s0, %s602_s14  ;;  %s230_s29 = scalar_lea.vmem [#allocation2], %s601_s12 }
  0x35   : > { %s238_s8 = sshll.u32 %s230_s29, 4  ;;  %p1094_p13 = pnand %p672_p12, %p1067_p6  ;;  %s1090_s8 = int_to_ptr.vmem [resolvable:$true] %s238_s8 }
  0x36   : > { %s227_s9 = scalar_lea.sflag [#allocation3], %s226_s30  ;;  %s759_s25 = scalar_lea.hbm %s1088_s17, 128 }
  0x37   : > { %p760_p0 = scmp.ne.s32.totalorder %s1088_s17, %s759_s25  ;;  %p761_p3 = pneg %p1094_p13 }
  0x38   : > { %s764_s15 = scalar_lea.hbm %s1279_s0, 256  ;;  %p765_p9 = scmp.lt.u32.totalorder %s1088_s17, %s1279_s0 }
  0x39   : > { %p762_p5 = pnand %p761_p3, %p760_p0  ;;  %p766_p1 = scmp.lt.u32.totalorder %s764_s15, %s759_s25 }
  0x3a   : > { %p768_p4 = scmp.lt.u32.totalorder %s759_s25, %s1088_s17 }
  0x3b   : > { %p763_p7 = pneg %p762_p5  ;;  %p767_p2 = por %p766_p1, %p765_p9 }
  0x3d   : > { %p769_p6 = por %p768_p4, %p767_p2 }
  0x3f   : > { %p770_p8 = pnand %p769_p6, %p763_p7 }
  0x41   : > { %773 = shalt.err (!%p770_p8)
}
  0x42   : > { %s774_s30 = scalar_lea.vmem %s1090_s8, 128  ;;  %s940_s29 = smov [#allocation2]  }
  0x43   : > { %p775_p12 = scmp.ne.s32.totalorder %s1090_s8, %s774_s30  ;;  %s779_s12 = sshll.u32 %s940_s29, 4  ;;  %s780_s12 = int_to_ptr.vmem [resolvable:$false] %s779_s12 }
  0x44   : > { %s781_s14 = scalar_lea.vmem %s780_s12, 256  ;;  %p782_p5 = scmp.lt.s32.totalorder %s1090_s8, %s780_s12 }
  0x45   : > { %p777_p11 = pnand %p775_p12, %p761_p3  ;;  %p783_p9 = scmp.lt.s32.totalorder %s781_s14, %s774_s30 }
  0x47   : > { %p778_p0 = pneg %p777_p11  ;;  %p784_p1 = por %p783_p9, %p782_p5 }
  0x49   : > { %p785_p2 = pnand %p784_p1, %p778_p0 }
  0x4b   : > { %788 = shalt.err (!%p785_p2)
}
  0x4c   : > { %660 = dma.hbm_to_vmem [thread:$0]  (!%p1094_p13), %s1088_s17, 128, %s1090_s8, %s227_s9  }
  0x4d   : > { %p1297_p7 = scmp.ne.s32.totalorder %s1291_s28, 0 }
  0x4e   : > { %s1126_s25 = sand.u32 (!%p1297_p7), 1, %s919_s19   ;;  %p1298_p3 = scmp.ne.s32.totalorder (!%p1297_p7), %s1289_s26, 0 }
  0x4f   : > { %247 = sbr.rel (%p1297_p7) target bundleno = 466 (0x1d2), region = 32  ;;  %s1129_s15 = sshll.u32 (!%p1297_p7), %s1126_s25, 3 }
  0x50   : > { %s250_s10 = scalar_lea.sflag (!%p1297_p7), [#allocation3], %s1126_s25  ;;  %s253_s16 = scalar_lea.vmem (!%p1297_p7), [#allocation2], %s1129_s15 }
  0x56   : > { %898 = dma.done.wait (%p1298_p3), %s250_s10, 128  }
  0x57   : > { %900 = vsyncadd (%p1298_p3), %s250_s10, 4294967168  ;;  %p1299_p13 = scmp.eq.s32.totalorder %s1010_s24, 0 }
  0x59   : > { %902 = dma.done.wait (%p1299_p13), [#allocation6], 512   ;;  %p1300_p4 = pmov %p1299_p13 }
  0x5a   : > { %v941_v0 = vmov 0.0|0.0   ;;  %vm942_vm0 = vmmov 0   ;;  %v943_v1 = vmov 0.0   ;;  %v295_v2 = vld [vmem:[#allocation5] sm:$0xff]  ;;  %v296_v3 = vld [vmem:[#allocation5 + $0x8] sm:$0xff]  ;;  %v297_v4 = vld [vmem:[#allocation5 + $0x10] sm:$0xff] }
  0x5b   : > { %904 = vsyncadd (%p1300_p4), [#allocation6], 4294966784  ;;  %635 = vmatprep.subr.bf16.mxu0 %v941_v0  ;;  %632 = vmatprep.mubr.msk.f32.mxu0 %vm942_vm0, %v943_v1  ;;  %v636_v5 = vpack.c.bf16 %v296_v3, %v295_v2  ;;  %v298_v6 = vld [vmem:[#allocation5 + $0x18] sm:$0xff]  ;;  %vm306_vm1 = vcmask 261120   ;;  %v609_v9 = vld [vmem:[%s1281_s2] ss:$0 sm:$0xff] }
  0x5c   : > { %v639_v7 = vpack.c.bf16 %v298_v6, %v297_v4  ;;  %v294_v8 = vld [vmem:[%s253_s16] sm:$0xff]  ;;  %s1146_s17 = sshll.u32 %s927_s21, 7  ;;  %s279_s8 = scalar_lea.vmem [#allocation7], %s1129_s15 }
  0x5d   : > { %637 = vmatpush3.bf16.msra.mxu0 %v636_v5  ;;  %s415_s6 = sshll.u32 %s279_s8, 4  ;;  %s1153_s29 = scalar_lea.hbm %s1282_s3, %s1146_s17  ;;  %s1155_s6 = int_to_ptr.vmem [resolvable:$true] %s415_s6 }
  0x5e   : > { %638 = vmatprep.subr.bf16.mxu0 %v941_v0  ;;  %s944_s12 = smov 96   ;;  %s391_s21 = scalar_lea.sflag [#allocation4], %s1126_s25 }
  0x5f   : > { %s789_s14 = scalar_lea.vmem %s1155_s6, 128  ;;  %s945_s10 = smov [#allocation7]  }
  0x60   : > { %p790_p6 = scmp.ne.s32.totalorder %s1155_s6, %s789_s14  ;;  %s793_s16 = sshll.u32 %s945_s10, 4  ;;  %s794_s16 = int_to_ptr.vmem [resolvable:$false] %s793_s16 }
  0x61   : > { %640 = vmatpush3.bf16.msra.mxu0 %v639_v7  ;;  %s795_s26 = scalar_lea.vmem %s794_s16, 256  ;;  %p796_p11 = scmp.lt.s32.totalorder %s1155_s6, %s794_s16 }
  0x62   : > { %p791_p8 = pnand %p790_p6, %p1073_p10  ;;  %p797_p0 = scmp.lt.s32.totalorder %s795_s26, %s789_s14 }
  0x64   : > { %633 = vmatmul.mubr.msk.f32.vlgmr.msra.gmra.mrb[0].mxu0 %vm306_vm1, %v294_v8  ;;  %p792_p12 = pneg %p791_p8  ;;  %p798_p5 = por %p797_p0, %p796_p11 }
  0x66   : > { %p799_p9 = pnand %p798_p5, %p792_p12 }
 0x137   : > { %v376_v10 = vpop.f32.mrb[0].mxu0 }
 0x138   : > { %v377_v11 = vadd.f32 %v609_v9, %v376_v10  ;;  %v634_v12 = vpop.f32.mrb[1].mxu0 }
 0x13a   : > { %382 = vrot.lane.b32.xlu0 %v377_v11, %s944_s12  ;;  %380 = vst.msk [vmem:[%s279_s8] sm:$0xff] %vm306_vm1, %v377_v11 }
 0x13b   : > { %802 = shalt.err (!%p799_p9)
}
 0x13c   : > { %s803_s25 = scalar_lea.hbm %s1153_s29, 128  ;;  %s807_s9 = scalar_lea.hbm %s1282_s3, 256 }
 0x13d   : > { %p804_p1 = scmp.ne.s32.totalorder %s1153_s29, %s803_s25  ;;  %p808_p3 = scmp.lt.u32.totalorder %s1153_s29, %s1282_s3 }
 0x13e   : > { %p809_p13 = scmp.lt.u32.totalorder %s807_s9, %s803_s25  ;;  %p811_p6 = scmp.lt.u32.totalorder %s803_s25, %s1153_s29 }
 0x13f   : > { %p805_p2 = pnand %p804_p1, %p1073_p10 }
 0x140   : > { %p810_p4 = por %p809_p13, %p808_p3 }
 0x141   : > { %p806_p7 = pneg %p805_p2 }
 0x142   : > { %p812_p8 = por %p811_p6, %p810_p4 }
 0x144   : > { %p813_p12 = pnand %p812_p8, %p806_p7 }
 0x146   : > { %816 = shalt.err (!%p813_p12)
}
 0x147   : > { %647 = dma.vmem_to_hbm [thread:$0]  (%p1073_p10), %s1155_s6, 128, %s1153_s29, %s391_s21  }
 0x148   : > { %s946_s14 = smov 64   ;;  %s395_s10 = sand.u32 1, %s1010_s24  }
 0x149   : > { %386 = vrot.lane.b32.xlu0 %v377_v11, %s946_s14  ;;  %s286_s16 = scalar_lea.vmem [#allocation8], %s1129_s15  ;;  %s1186_s8 = scalar_lea.hbm %s1283_s4, %s1146_s17 }
 0x14a   : > { %s429_s26 = sshll.u32 %s286_s16, 4  ;;  %s293_s9 = scalar_lea.vmem [#allocation10], %s1129_s15  ;;  %s1188_s26 = int_to_ptr.vmem [resolvable:$true] %s429_s26 }
 0x14b   : > { %s1193_s30 = sshll.u32 %s293_s9, 4  ;;  %s1196_s24 = scalar_lea.sflag [#allocation9], %s395_s10  ;;  %s1227_s30 = int_to_ptr.vmem [resolvable:$true] %s1193_s30 }
 0x14c   : > { %s817_s6 = scalar_lea.vmem %s1188_s26, 128  ;;  %s947_s29 = smov [#allocation8]  }
 0x14d   : > { %p818_p11 = scmp.ne.s32.totalorder %s1188_s26, %s817_s6  ;;  %s821_s21 = sshll.u32 %s947_s29, 4  ;;  %s822_s21 = int_to_ptr.vmem [resolvable:$false] %s821_s21 }
 0x14e   : > { %s823_s12 = scalar_lea.vmem %s822_s21, 256  ;;  %p824_p9 = scmp.lt.s32.totalorder %s1188_s26, %s822_s21 }
 0x14f   : > { %p819_p0 = pnand %p818_p11, %p1073_p10  ;;  %p825_p1 = scmp.lt.s32.totalorder %s823_s12, %s817_s6 }
 0x151   : > { %p820_p5 = pneg %p819_p0  ;;  %p826_p2 = por %p825_p1, %p824_p9 }
 0x153   : > { %p827_p7 = pnand %p826_p2, %p820_p5 }
 0x1ac   : > { %v383_v13 = vpop.permute.xlu0 %382 }
 0x1ad   : > { %385 = vst.msk [vmem:[%s286_s16] sm:$0xff] %vm306_vm1, %v383_v13 }
 0x1ae   : > { %830 = shalt.err (!%p827_p7)
}
 0x1af   : > { %s831_s14 = scalar_lea.hbm %s1186_s8, 128  ;;  %s835_s25 = scalar_lea.hbm %s1283_s4, 256 }
 0x1b0   : > { %p832_p3 = scmp.ne.s32.totalorder %s1186_s8, %s831_s14  ;;  %p836_p6 = scmp.lt.u32.totalorder %s1186_s8, %s1283_s4 }
 0x1b1   : > { %p837_p8 = scmp.lt.u32.totalorder %s835_s25, %s831_s14  ;;  %p839_p11 = scmp.lt.u32.totalorder %s831_s14, %s1186_s8 }
 0x1b2   : > { %p833_p13 = pnand %p832_p3, %p1073_p10 }
 0x1b3   : > { %p838_p12 = por %p837_p8, %p836_p6 }
 0x1b4   : > { %p834_p4 = pneg %p833_p13 }
 0x1b5   : > { %p840_p0 = por %p839_p11, %p838_p12 }
 0x1b7   : > { %p841_p5 = pnand %p840_p0, %p834_p4 }
 0x1b9   : > { %844 = shalt.err (!%p841_p5)
}
 0x1ba   : > { %648 = dma.vmem_to_hbm [thread:$0]  (%p1073_p10), %s1188_s26, 128, %s1186_s8, %s1196_s24  }
 0x1bb   : > { %s1224_s12 = scalar_lea.hbm %s1284_s5, %s1146_s17  ;;  %v387_v14 = vpop.permute.xlu0 %386  ;;  %s845_s14 = scalar_lea.vmem %s1227_s30, 128 }
 0x1bc   : > { %389 = vst.msk [vmem:[%s293_s9] sm:$0xff] %vm306_vm1, %v387_v14  ;;  %p846_p9 = scmp.ne.s32.totalorder %s1227_s30, %s845_s14  ;;  %s948_s26 = smov [#allocation10]  }
 0x1bd   : > { %s849_s8 = sshll.u32 %s948_s26, 4  ;;  %s850_s8 = int_to_ptr.vmem [resolvable:$false] %s849_s8 }
 0x1be   : > { %p847_p1 = pnand %p846_p9, %p1073_p10  ;;  %s851_s10 = scalar_lea.vmem %s850_s8, 256 }
 0x1bf   : > { %p852_p7 = scmp.lt.s32.totalorder %s1227_s30, %s850_s8  ;;  %p853_p3 = scmp.lt.s32.totalorder %s851_s10, %s845_s14 }
 0x1c0   : > { %p848_p2 = pneg %p847_p1 }
 0x1c1   : > { %p854_p13 = por %p853_p3, %p852_p7 }
 0x1c3   : > { %p855_p4 = pnand %p854_p13, %p848_p2 }
 0x1c5   : > { %858 = shalt.err (!%p855_p4)
}
 0x1c6   : > { %s859_s15 = scalar_lea.hbm %s1224_s12, 128  ;;  %s863_s16 = scalar_lea.hbm %s1284_s5, 256 }
 0x1c7   : > { %p860_p6 = scmp.ne.s32.totalorder %s1224_s12, %s859_s15  ;;  %p864_p11 = scmp.lt.u32.totalorder %s1224_s12, %s1284_s5 }
 0x1c8   : > { %p865_p0 = scmp.lt.u32.totalorder %s863_s16, %s859_s15  ;;  %p867_p9 = scmp.lt.u32.totalorder %s859_s15, %s1224_s12 }
 0x1c9   : > { %p861_p8 = pnand %p860_p6, %p1073_p10 }
 0x1ca   : > { %p866_p5 = por %p865_p0, %p864_p11 }
 0x1cb   : > { %p862_p12 = pneg %p861_p8 }
 0x1cc   : > { %p868_p1 = por %p867_p9, %p866_p5 }
 0x1ce   : > { %p869_p2 = pnand %p868_p1, %p862_p12 }
 0x1d0   : > { %872 = shalt.err (!%p869_p2)
}
 0x1d1   : > { %649 = dma.vmem_to_hbm [thread:$0]  (%p1073_p10), %s1227_s30, 128, %s1224_s12, %s1196_s24  }
 0x1d2 PF: > { %s455_s29 = sand.u32 1, %s915_s18   ;;  %p1301_p7 = scmp.ne.s32.totalorder %s1290_s27, 0 }
 0x1d3   : > { %p1302_p3 = scmp.ge.s32.totalorder %s935_s23, 2  ;;  %s456_s6 = scalar_lea.sflag [#allocation4], %s455_s29 }
 0x1d5   : > { %p662_p13 = pnand %p1302_p3, %p1301_p7 }
 0x1d7   : > { %906 = dma.done.wait (!%p662_p13), %s456_s6, 128  }
 0x1d8   : > { %908 = vsyncadd (!%p662_p13), %s456_s6, 4294967168  ;;  %s1303_s21 = sadd.s32 4294967294, %s935_s23  }
 0x1d9   : > { %s464_s14 = sand.u32 1, %s1303_s21  }
 0x1da   : > { %s465_s26 = scalar_lea.sflag [#allocation9], %s464_s14 }
 0x1db   : > { %910 = dma.done.wait (!%p662_p13), %s465_s26, 256  }
 0x1dc   : > { %912 = vsyncadd (!%p662_p13), %s465_s26, 4294967040  ;;  %s26_s23 = sadd.s32 1, %s935_s23   ;;  %s1304_s18 = smov %s919_s19 }
 0x1dd   : > { %p23_p10 = scmp.ge.s32.totalorder %s26_s23, 4   ;;  %s1305_s19 = smov %s923_s20 }
 0x1de   : > { %s1306_s20 = smov %s1082_s13  ;;  %s1307_s21 = smov %s931_s22 }
 0x1df   : > { %s1308_s22 = smov %s1310_s7  ;;  %25 = sbr.rel (!%p23_p10) target bundleno = 9 (0x9), region = 113 }
 0x1e6   :  { %479 = vsyncpa [#allocation3], 1 }
 0x1e7   :  { %481 = vsyncpa [#allocation3 + $0x1], 1 }
 0x1e8   :  { %482 = vsyncpa [#allocation6], 1 }
 0x1e9   :  { %483 = vsyncpa [#allocation4], 1 }
 0x1ea   :  { %485 = vsyncpa [#allocation4 + $0x1], 1 }
 0x1eb   :  { %486 = vsyncpa [#allocation9], 1 }
 0x1ec   :  { %488 = vsyncpa [#allocation9 + $0x1], 1 }

</bundles_post_ra>
